<compile_context>
chip_gen: v7x
topology: tpu7x:2x2x1
jax: 0.10.0
libtpu: 0.0.40
codegen_flags: <defaults>
</compile_context>

<pallas_src>
import jax
import jax.numpy as jnp
from jax.experimental import pallas as pl
from jax.experimental.pallas import tpu as pltpu


def _lstm_head_kernel(x_ref, wih_ref, whh_ref, b_ref, lw_ref, lb_ref, out_ref):
    TB, _ = x_ref.shape            # x is time-major: rows are (t, b), t-major
    H = whh_ref.shape[0]           # whh_ref: (H, 4H)
    B = out_ref.shape[0]
    T = TB // B

    # ---- Preamble: hoisted input projection for ALL timesteps at once. ----
    # One (T*B, F) @ (F, 4H) MXU matmul, entirely off the serial h->h chain.
    # Result stays in registers (T*B=64 rows x 4H=128 lanes = 8 f32 vregs).
    xg = (jnp.dot(x_ref[...], wih_ref[...], preferred_element_type=jnp.float32)
          + b_ref[...])                               # (T*B, 4H)

    # Recurrent weight held in bf16 for single-pass MXU matmuls on the chain.
    whh_bf = whh_ref[...].astype(jnp.bfloat16)        # (H, 4H)

    h = jnp.zeros((B, H), jnp.float32)                # h0 = c0 = 0 (PyTorch)
    c = jnp.zeros((B, H), jnp.float32)

    # Fully unrolled static recurrence: every slice below is static/aligned.
    for t in range(T):
        # Only this matmul is on the serial critical path (bf16 in, f32 acc).
        gates = xg[t * B:(t + 1) * B, :] + jnp.dot(
            h.astype(jnp.bfloat16), whh_bf,
            preferred_element_type=jnp.float32)       # (B, 4H) = one vreg

        # Full 128-lane activations; sigmoid = exp + approx-reciprocal (EUP).
        sg = pl.reciprocal(1.0 + jnp.exp(-gates), approx=True)
        th = jnp.tanh(gates)

        i_g = sg[:, 0 * H:1 * H]                      # static lane slices
        f_g = sg[:, 1 * H:2 * H]
        g_g = th[:, 2 * H:3 * H]
        o_g = sg[:, 3 * H:4 * H]

        c = f_g * c + i_g * g_g
        h = o_g * jnp.tanh(c)

    # Linear(H, 1) head on hn[0]: VPU multiply + lane reduction.
    out_ref[...] = (jnp.sum(h * lw_ref[...], axis=-1, keepdims=True)
                    + lb_ref[...])


def shallow_regression_lstm_forward(x, params):
    """x: (B, T, F) float32 (batch_first, like the PyTorch module).  -> (B,)"""
    B, T, F = x.shape

    # One-time tiny XLA transpose to TIME-MAJOR rows so the kernel's per-step
    # gate tiles are contiguous static sublane slices (no in-kernel gathers).
    x_tm = jnp.transpose(x, (1, 0, 2)).reshape(T * B, F)

    vmem = lambda: pl.BlockSpec(memory_space=pltpu.MemorySpace.VMEM)
    out = pl.pallas_call(
        _lstm_head_kernel,
        out_shape=jax.ShapeDtypeStruct((B, 1), jnp.float32),
        in_specs=[vmem() for _ in range(6)],
        out_specs=vmem(),
    )(x_tm, params["wih_t"], params["whh_t"], params["b"],
      params["lw_row"], params["lb"])

    return out.reshape(-1)   # matches `self.linear(hn[0]).flatten()`


def init_params(key, num_sensors, hidden_units):
    """Init matching PyTorch LSTM/Linear default U(-1/sqrt(H), 1/sqrt(H))."""
    H, F = hidden_units, num_sensors
    k = 1.0 / jnp.sqrt(jnp.float32(H))
    keys = jax.random.split(key, 6)
    wih = jax.random.uniform(keys[0], (4 * H, F), jnp.float32, -k, k)
    whh = jax.random.uniform(keys[1], (4 * H, H), jnp.float32, -k, k)
    bih = jax.random.uniform(keys[2], (4 * H,), jnp.float32, -k, k)
    bhh = jax.random.uniform(keys[3], (4 * H,), jnp.float32, -k, k)
    lw = jax.random.uniform(keys[4], (1, H), jnp.float32, -k, k)
    lb = jax.random.uniform(keys[5], (1,), jnp.float32, -k, k)
    return {
        "wih_t": wih.T,                        # (F, 4H)
        "whh_t": whh.T,                        # (H, 4H)
        "b": (bih + bhh).reshape(1, 4 * H),    # (1, 4H) = b_ih + b_hh
        "lw_row": lw,                          # (1, H)   Linear weight as a row
        "lb": lb.reshape(1, 1),                # (1, 1)
    }


def reference_forward(x, params):
    """Pure-JAX (f32) reference of the PyTorch forward for validation."""
    B, T, F = x.shape
    H = params["whh_t"].shape[0]
    h = jnp.zeros((B, H), jnp.float32)
    c = jnp.zeros((B, H), jnp.float32)

    def step(carry, x_t):
        h, c = carry
        gates = (x_t @ params["wih_t"] + params["b"]) + h @ params["whh_t"]
        i = jax.nn.sigmoid(gates[:, 0 * H:1 * H])
        f = jax.nn.sigmoid(gates[:, 1 * H:2 * H])
        g = jnp.tanh(gates[:, 2 * H:3 * H])
        o = jax.nn.sigmoid(gates[:, 3 * H:4 * H])
        c = f * c + i * g
        h = o * jnp.tanh(c)
        return (h, c), None

    (h, _), _ = jax.lax.scan(step, (h, c), jnp.transpose(x, (1, 0, 2)))
    return jnp.sum(h * params["lw_row"], axis=-1) + params["lb"][0, 0]


if __name__ == "__main__":
    num_sensors = 4      # F
    hidden_units = 32    # H  (4H = 128 -> gates fill exactly one 128-lane vreg)
    batch = 8
    seq_len = 8

    key = jax.random.PRNGKey(0)
    kx, kp = jax.random.split(key)
    x = jax.random.normal(kx, (batch, seq_len, num_sensors), jnp.float32)
    params = init_params(kp, num_sensors, hidden_units)

    out = jax.block_until_ready(shallow_regression_lstm_forward(x, params))
    ref = jax.block_until_ready(reference_forward(x, params))

    assert out.shape == (batch,)
    # Tolerance loosened vs. 1e-5: bf16 recurrent matmul + approx reciprocal.
    assert jnp.allclose(out, ref, atol=2e-2, rtol=2e-2), (out, ref)

    print("KERNEL_OK")
</pallas_src>

<mosaic_0001>
module attributes {stable_mosaic.version = 11 : i64} {
  func.func @_lstm_head_kernel(%arg0: memref<64x4xf32, #tpu.memory_space<vmem>>, %arg1: memref<4x128xf32, #tpu.memory_space<vmem>>, %arg2: memref<32x128xf32, #tpu.memory_space<vmem>>, %arg3: memref<1x128xf32, #tpu.memory_space<vmem>>, %arg4: memref<1x32xf32, #tpu.memory_space<vmem>>, %arg5: memref<1x1xf32, #tpu.memory_space<vmem>>, %arg6: memref<8x1xf32, #tpu.memory_space<vmem>>) attributes {dimension_semantics = [], scalar_prefetch = 0 : i64, scratch_operands = 0 : i64, tpu.core_type = #tpu.core_type<tc>} {
    %c0 = arith.constant 0 : index
    %c0_0 = arith.constant 0 : index
    %0 = vector.load %arg0[%c0, %c0_0] : memref<64x4xf32, #tpu.memory_space<vmem>>, vector<64x4xf32>
    %c0_1 = arith.constant 0 : index
    %c0_2 = arith.constant 0 : index
    %1 = vector.load %arg1[%c0_1, %c0_2] : memref<4x128xf32, #tpu.memory_space<vmem>>, vector<4x128xf32>
    %cst = arith.constant dense<0.000000e+00> : vector<64x128xf32>
    %2 = tpu.matmul %0, %1, %cst {dimension_numbers = #tpu.dot_dimension_numbers<[1], [0], [0], [1], [0, 0, 1, 1], [], []>} : vector<64x4xf32>, vector<4x128xf32>, vector<64x128xf32> -> vector<64x128xf32>
    %c0_3 = arith.constant 0 : index
    %c0_4 = arith.constant 0 : index
    %3 = vector.load %arg3[%c0_3, %c0_4] : memref<1x128xf32, #tpu.memory_space<vmem>>, vector<1x128xf32>
    %4 = vector.broadcast %3 : vector<1x128xf32> to vector<64x128xf32>
    %5 = arith.addf %2, %4 : vector<64x128xf32>
    %c0_5 = arith.constant 0 : index
    %c0_6 = arith.constant 0 : index
    %6 = vector.load %arg2[%c0_5, %c0_6] : memref<32x128xf32, #tpu.memory_space<vmem>>, vector<32x128xf32>
    %7 = arith.truncf %6 : vector<32x128xf32> to vector<32x128xbf16>
    %cst_7 = arith.constant 0.000000e+00 : f32
    %8 = vector.broadcast %cst_7 : f32 to vector<8x32xf32>
    %cst_8 = arith.constant 0.000000e+00 : f32
    %9 = vector.broadcast %cst_8 : f32 to vector<8x32xf32>
    %10 = vector.extract_strided_slice %5 {offsets = [0, 0], sizes = [8, 128], strides = [1, 1]} : vector<64x128xf32> to vector<8x128xf32>
    %11 = arith.truncf %8 : vector<8x32xf32> to vector<8x32xbf16>
    %cst_9 = arith.constant dense<0.000000e+00> : vector<8x128xf32>
    %12 = tpu.matmul %11, %7, %cst_9 {dimension_numbers = #tpu.dot_dimension_numbers<[1], [0], [0], [1], [0, 0, 1, 1], [], []>} : vector<8x32xbf16>, vector<32x128xbf16>, vector<8x128xf32> -> vector<8x128xf32>
    %13 = arith.addf %10, %12 : vector<8x128xf32>
    %cst_10 = arith.constant 0.000000e+00 : f32
    %14 = vector.broadcast %cst_10 : f32 to vector<8x128xf32>
    %15 = arith.subf %14, %13 : vector<8x128xf32>
    %16 = math.exp %15 : vector<8x128xf32>
    %cst_11 = arith.constant 1.000000e+00 : f32
    %17 = vector.broadcast %cst_11 : f32 to vector<8x128xf32>
    %18 = arith.addf %17, %16 : vector<8x128xf32>
    %19 = tpu.reciprocal %18 {approx = true} : vector<8x128xf32> -> vector<8x128xf32>
    %20 = math.tanh %13 : vector<8x128xf32>
    %21 = vector.extract_strided_slice %19 {offsets = [0, 0], sizes = [8, 32], strides = [1, 1]} : vector<8x128xf32> to vector<8x32xf32>
    %22 = vector.extract_strided_slice %19 {offsets = [0, 32], sizes = [8, 32], strides = [1, 1]} : vector<8x128xf32> to vector<8x32xf32>
    %23 = vector.extract_strided_slice %20 {offsets = [0, 64], sizes = [8, 32], strides = [1, 1]} : vector<8x128xf32> to vector<8x32xf32>
    %24 = vector.extract_strided_slice %19 {offsets = [0, 96], sizes = [8, 32], strides = [1, 1]} : vector<8x128xf32> to vector<8x32xf32>
    %25 = arith.mulf %22, %9 : vector<8x32xf32>
    %26 = arith.mulf %21, %23 : vector<8x32xf32>
    %27 = arith.addf %25, %26 : vector<8x32xf32>
    %28 = math.tanh %27 : vector<8x32xf32>
    %29 = arith.mulf %24, %28 : vector<8x32xf32>
    %30 = vector.extract_strided_slice %5 {offsets = [8, 0], sizes = [8, 128], strides = [1, 1]} : vector<64x128xf32> to vector<8x128xf32>
    %31 = arith.truncf %29 : vector<8x32xf32> to vector<8x32xbf16>
    %cst_12 = arith.constant dense<0.000000e+00> : vector<8x128xf32>
    %32 = tpu.matmul %31, %7, %cst_12 {dimension_numbers = #tpu.dot_dimension_numbers<[1], [0], [0], [1], [0, 0, 1, 1], [], []>} : vector<8x32xbf16>, vector<32x128xbf16>, vector<8x128xf32> -> vector<8x128xf32>
    %33 = arith.addf %30, %32 : vector<8x128xf32>
    %cst_13 = arith.constant 0.000000e+00 : f32
    %34 = vector.broadcast %cst_13 : f32 to vector<8x128xf32>
    %35 = arith.subf %34, %33 : vector<8x128xf32>
    %36 = math.exp %35 : vector<8x128xf32>
    %cst_14 = arith.constant 1.000000e+00 : f32
    %37 = vector.broadcast %cst_14 : f32 to vector<8x128xf32>
    %38 = arith.addf %37, %36 : vector<8x128xf32>
    %39 = tpu.reciprocal %38 {approx = true} : vector<8x128xf32> -> vector<8x128xf32>
    %40 = math.tanh %33 : vector<8x128xf32>
    %41 = vector.extract_strided_slice %39 {offsets = [0, 0], sizes = [8, 32], strides = [1, 1]} : vector<8x128xf32> to vector<8x32xf32>
    %42 = vector.extract_strided_slice %39 {offsets = [0, 32], sizes = [8, 32], strides = [1, 1]} : vector<8x128xf32> to vector<8x32xf32>
    %43 = vector.extract_strided_slice %40 {offsets = [0, 64], sizes = [8, 32], strides = [1, 1]} : vector<8x128xf32> to vector<8x32xf32>
    %44 = vector.extract_strided_slice %39 {offsets = [0, 96], sizes = [8, 32], strides = [1, 1]} : vector<8x128xf32> to vector<8x32xf32>
    %45 = arith.mulf %42, %27 : vector<8x32xf32>
    %46 = arith.mulf %41, %43 : vector<8x32xf32>
    %47 = arith.addf %45, %46 : vector<8x32xf32>
    %48 = math.tanh %47 : vector<8x32xf32>
    %49 = arith.mulf %44, %48 : vector<8x32xf32>
    %50 = vector.extract_strided_slice %5 {offsets = [16, 0], sizes = [8, 128], strides = [1, 1]} : vector<64x128xf32> to vector<8x128xf32>
    %51 = arith.truncf %49 : vector<8x32xf32> to vector<8x32xbf16>
    %cst_15 = arith.constant dense<0.000000e+00> : vector<8x128xf32>
    %52 = tpu.matmul %51, %7, %cst_15 {dimension_numbers = #tpu.dot_dimension_numbers<[1], [0], [0], [1], [0, 0, 1, 1], [], []>} : vector<8x32xbf16>, vector<32x128xbf16>, vector<8x128xf32> -> vector<8x128xf32>
    %53 = arith.addf %50, %52 : vector<8x128xf32>
    %cst_16 = arith.constant 0.000000e+00 : f32
    %54 = vector.broadcast %cst_16 : f32 to vector<8x128xf32>
    %55 = arith.subf %54, %53 : vector<8x128xf32>
    %56 = math.exp %55 : vector<8x128xf32>
    %cst_17 = arith.constant 1.000000e+00 : f32
    %57 = vector.broadcast %cst_17 : f32 to vector<8x128xf32>
    %58 = arith.addf %57, %56 : vector<8x128xf32>
    %59 = tpu.reciprocal %58 {approx = true} : vector<8x128xf32> -> vector<8x128xf32>
    %60 = math.tanh %53 : vector<8x128xf32>
    %61 = vector.extract_strided_slice %59 {offsets = [0, 0], sizes = [8, 32], strides = [1, 1]} : vector<8x128xf32> to vector<8x32xf32>
    %62 = vector.extract_strided_slice %59 {offsets = [0, 32], sizes = [8, 32], strides = [1, 1]} : vector<8x128xf32> to vector<8x32xf32>
    %63 = vector.extract_strided_slice %60 {offsets = [0, 64], sizes = [8, 32], strides = [1, 1]} : vector<8x128xf32> to vector<8x32xf32>
    %64 = vector.extract_strided_slice %59 {offsets = [0, 96], sizes = [8, 32], strides = [1, 1]} : vector<8x128xf32> to vector<8x32xf32>
    %65 = arith.mulf %62, %47 : vector<8x32xf32>
    %66 = arith.mulf %61, %63 : vector<8x32xf32>
    %67 = arith.addf %65, %66 : vector<8x32xf32>
    %68 = math.tanh %67 : vector<8x32xf32>
    %69 = arith.mulf %64, %68 : vector<8x32xf32>
    %70 = vector.extract_strided_slice %5 {offsets = [24, 0], sizes = [8, 128], strides = [1, 1]} : vector<64x128xf32> to vector<8x128xf32>
    %71 = arith.truncf %69 : vector<8x32xf32> to vector<8x32xbf16>
    %cst_18 = arith.constant dense<0.000000e+00> : vector<8x128xf32>
    %72 = tpu.matmul %71, %7, %cst_18 {dimension_numbers = #tpu.dot_dimension_numbers<[1], [0], [0], [1], [0, 0, 1, 1], [], []>} : vector<8x32xbf16>, vector<32x128xbf16>, vector<8x128xf32> -> vector<8x128xf32>
    %73 = arith.addf %70, %72 : vector<8x128xf32>
    %cst_19 = arith.constant 0.000000e+00 : f32
    %74 = vector.broadcast %cst_19 : f32 to vector<8x128xf32>
    %75 = arith.subf %74, %73 : vector<8x128xf32>
    %76 = math.exp %75 : vector<8x128xf32>
    %cst_20 = arith.constant 1.000000e+00 : f32
    %77 = vector.broadcast %cst_20 : f32 to vector<8x128xf32>
    %78 = arith.addf %77, %76 : vector<8x128xf32>
    %79 = tpu.reciprocal %78 {approx = true} : vector<8x128xf32> -> vector<8x128xf32>
    %80 = math.tanh %73 : vector<8x128xf32>
    %81 = vector.extract_strided_slice %79 {offsets = [0, 0], sizes = [8, 32], strides = [1, 1]} : vector<8x128xf32> to vector<8x32xf32>
    %82 = vector.extract_strided_slice %79 {offsets = [0, 32], sizes = [8, 32], strides = [1, 1]} : vector<8x128xf32> to vector<8x32xf32>
    %83 = vector.extract_strided_slice %80 {offsets = [0, 64], sizes = [8, 32], strides = [1, 1]} : vector<8x128xf32> to vector<8x32xf32>
    %84 = vector.extract_strided_slice %79 {offsets = [0, 96], sizes = [8, 32], strides = [1, 1]} : vector<8x128xf32> to vector<8x32xf32>
    %85 = arith.mulf %82, %67 : vector<8x32xf32>
    %86 = arith.mulf %81, %83 : vector<8x32xf32>
    %87 = arith.addf %85, %86 : vector<8x32xf32>
    %88 = math.tanh %87 : vector<8x32xf32>
    %89 = arith.mulf %84, %88 : vector<8x32xf32>
    %90 = vector.extract_strided_slice %5 {offsets = [32, 0], sizes = [8, 128], strides = [1, 1]} : vector<64x128xf32> to vector<8x128xf32>
    %91 = arith.truncf %89 : vector<8x32xf32> to vector<8x32xbf16>
    %cst_21 = arith.constant dense<0.000000e+00> : vector<8x128xf32>
    %92 = tpu.matmul %91, %7, %cst_21 {dimension_numbers = #tpu.dot_dimension_numbers<[1], [0], [0], [1], [0, 0, 1, 1], [], []>} : vector<8x32xbf16>, vector<32x128xbf16>, vector<8x128xf32> -> vector<8x128xf32>
    %93 = arith.addf %90, %92 : vector<8x128xf32>
    %cst_22 = arith.constant 0.000000e+00 : f32
    %94 = vector.broadcast %cst_22 : f32 to vector<8x128xf32>
    %95 = arith.subf %94, %93 : vector<8x128xf32>
    %96 = math.exp %95 : vector<8x128xf32>
    %cst_23 = arith.constant 1.000000e+00 : f32
    %97 = vector.broadcast %cst_23 : f32 to vector<8x128xf32>
    %98 = arith.addf %97, %96 : vector<8x128xf32>
    %99 = tpu.reciprocal %98 {approx = true} : vector<8x128xf32> -> vector<8x128xf32>
    %100 = math.tanh %93 : vector<8x128xf32>
    %101 = vector.extract_strided_slice %99 {offsets = [0, 0], sizes = [8, 32], strides = [1, 1]} : vector<8x128xf32> to vector<8x32xf32>
    %102 = vector.extract_strided_slice %99 {offsets = [0, 32], sizes = [8, 32], strides = [1, 1]} : vector<8x128xf32> to vector<8x32xf32>
    %103 = vector.extract_strided_slice %100 {offsets = [0, 64], sizes = [8, 32], strides = [1, 1]} : vector<8x128xf32> to vector<8x32xf32>
    %104 = vector.extract_strided_slice %99 {offsets = [0, 96], sizes = [8, 32], strides = [1, 1]} : vector<8x128xf32> to vector<8x32xf32>
    %105 = arith.mulf %102, %87 : vector<8x32xf32>
    %106 = arith.mulf %101, %103 : vector<8x32xf32>
    %107 = arith.addf %105, %106 : vector<8x32xf32>
    %108 = math.tanh %107 : vector<8x32xf32>
    %109 = arith.mulf %104, %108 : vector<8x32xf32>
    %110 = vector.extract_strided_slice %5 {offsets = [40, 0], sizes = [8, 128], strides = [1, 1]} : vector<64x128xf32> to vector<8x128xf32>
    %111 = arith.truncf %109 : vector<8x32xf32> to vector<8x32xbf16>
    %cst_24 = arith.constant dense<0.000000e+00> : vector<8x128xf32>
    %112 = tpu.matmul %111, %7, %cst_24 {dimension_numbers = #tpu.dot_dimension_numbers<[1], [0], [0], [1], [0, 0, 1, 1], [], []>} : vector<8x32xbf16>, vector<32x128xbf16>, vector<8x128xf32> -> vector<8x128xf32>
    %113 = arith.addf %110, %112 : vector<8x128xf32>
    %cst_25 = arith.constant 0.000000e+00 : f32
    %114 = vector.broadcast %cst_25 : f32 to vector<8x128xf32>
    %115 = arith.subf %114, %113 : vector<8x128xf32>
    %116 = math.exp %115 : vector<8x128xf32>
    %cst_26 = arith.constant 1.000000e+00 : f32
    %117 = vector.broadcast %cst_26 : f32 to vector<8x128xf32>
    %118 = arith.addf %117, %116 : vector<8x128xf32>
    %119 = tpu.reciprocal %118 {approx = true} : vector<8x128xf32> -> vector<8x128xf32>
    %120 = math.tanh %113 : vector<8x128xf32>
    %121 = vector.extract_strided_slice %119 {offsets = [0, 0], sizes = [8, 32], strides = [1, 1]} : vector<8x128xf32> to vector<8x32xf32>
    %122 = vector.extract_strided_slice %119 {offsets = [0, 32], sizes = [8, 32], strides = [1, 1]} : vector<8x128xf32> to vector<8x32xf32>
    %123 = vector.extract_strided_slice %120 {offsets = [0, 64], sizes = [8, 32], strides = [1, 1]} : vector<8x128xf32> to vector<8x32xf32>
    %124 = vector.extract_strided_slice %119 {offsets = [0, 96], sizes = [8, 32], strides = [1, 1]} : vector<8x128xf32> to vector<8x32xf32>
    %125 = arith.mulf %122, %107 : vector<8x32xf32>
    %126 = arith.mulf %121, %123 : vector<8x32xf32>
    %127 = arith.addf %125, %126 : vector<8x32xf32>
    %128 = math.tanh %127 : vector<8x32xf32>
    %129 = arith.mulf %124, %128 : vector<8x32xf32>
    %130 = vector.extract_strided_slice %5 {offsets = [48, 0], sizes = [8, 128], strides = [1, 1]} : vector<64x128xf32> to vector<8x128xf32>
    %131 = arith.truncf %129 : vector<8x32xf32> to vector<8x32xbf16>
    %cst_27 = arith.constant dense<0.000000e+00> : vector<8x128xf32>
    %132 = tpu.matmul %131, %7, %cst_27 {dimension_numbers = #tpu.dot_dimension_numbers<[1], [0], [0], [1], [0, 0, 1, 1], [], []>} : vector<8x32xbf16>, vector<32x128xbf16>, vector<8x128xf32> -> vector<8x128xf32>
    %133 = arith.addf %130, %132 : vector<8x128xf32>
    %cst_28 = arith.constant 0.000000e+00 : f32
    %134 = vector.broadcast %cst_28 : f32 to vector<8x128xf32>
    %135 = arith.subf %134, %133 : vector<8x128xf32>
    %136 = math.exp %135 : vector<8x128xf32>
    %cst_29 = arith.constant 1.000000e+00 : f32
    %137 = vector.broadcast %cst_29 : f32 to vector<8x128xf32>
    %138 = arith.addf %137, %136 : vector<8x128xf32>
    %139 = tpu.reciprocal %138 {approx = true} : vector<8x128xf32> -> vector<8x128xf32>
    %140 = math.tanh %133 : vector<8x128xf32>
    %141 = vector.extract_strided_slice %139 {offsets = [0, 0], sizes = [8, 32], strides = [1, 1]} : vector<8x128xf32> to vector<8x32xf32>
    %142 = vector.extract_strided_slice %139 {offsets = [0, 32], sizes = [8, 32], strides = [1, 1]} : vector<8x128xf32> to vector<8x32xf32>
    %143 = vector.extract_strided_slice %140 {offsets = [0, 64], sizes = [8, 32], strides = [1, 1]} : vector<8x128xf32> to vector<8x32xf32>
    %144 = vector.extract_strided_slice %139 {offsets = [0, 96], sizes = [8, 32], strides = [1, 1]} : vector<8x128xf32> to vector<8x32xf32>
    %145 = arith.mulf %142, %127 : vector<8x32xf32>
    %146 = arith.mulf %141, %143 : vector<8x32xf32>
    %147 = arith.addf %145, %146 : vector<8x32xf32>
    %148 = math.tanh %147 : vector<8x32xf32>
    %149 = arith.mulf %144, %148 : vector<8x32xf32>
    %150 = vector.extract_strided_slice %5 {offsets = [56, 0], sizes = [8, 128], strides = [1, 1]} : vector<64x128xf32> to vector<8x128xf32>
    %151 = arith.truncf %149 : vector<8x32xf32> to vector<8x32xbf16>
    %cst_30 = arith.constant dense<0.000000e+00> : vector<8x128xf32>
    %152 = tpu.matmul %151, %7, %cst_30 {dimension_numbers = #tpu.dot_dimension_numbers<[1], [0], [0], [1], [0, 0, 1, 1], [], []>} : vector<8x32xbf16>, vector<32x128xbf16>, vector<8x128xf32> -> vector<8x128xf32>
    %153 = arith.addf %150, %152 : vector<8x128xf32>
    %cst_31 = arith.constant 0.000000e+00 : f32
    %154 = vector.broadcast %cst_31 : f32 to vector<8x128xf32>
    %155 = arith.subf %154, %153 : vector<8x128xf32>
    %156 = math.exp %155 : vector<8x128xf32>
    %cst_32 = arith.constant 1.000000e+00 : f32
    %157 = vector.broadcast %cst_32 : f32 to vector<8x128xf32>
    %158 = arith.addf %157, %156 : vector<8x128xf32>
    %159 = tpu.reciprocal %158 {approx = true} : vector<8x128xf32> -> vector<8x128xf32>
    %160 = math.tanh %153 : vector<8x128xf32>
    %161 = vector.extract_strided_slice %159 {offsets = [0, 0], sizes = [8, 32], strides = [1, 1]} : vector<8x128xf32> to vector<8x32xf32>
    %162 = vector.extract_strided_slice %159 {offsets = [0, 32], sizes = [8, 32], strides = [1, 1]} : vector<8x128xf32> to vector<8x32xf32>
    %163 = vector.extract_strided_slice %160 {offsets = [0, 64], sizes = [8, 32], strides = [1, 1]} : vector<8x128xf32> to vector<8x32xf32>
    %164 = vector.extract_strided_slice %159 {offsets = [0, 96], sizes = [8, 32], strides = [1, 1]} : vector<8x128xf32> to vector<8x32xf32>
    %165 = arith.mulf %162, %147 : vector<8x32xf32>
    %166 = arith.mulf %161, %163 : vector<8x32xf32>
    %167 = arith.addf %165, %166 : vector<8x32xf32>
    %168 = math.tanh %167 : vector<8x32xf32>
    %169 = arith.mulf %164, %168 : vector<8x32xf32>
    %c0_33 = arith.constant 0 : index
    %c0_34 = arith.constant 0 : index
    %170 = vector.load %arg4[%c0_33, %c0_34] : memref<1x32xf32, #tpu.memory_space<vmem>>, vector<1x32xf32>
    %171 = vector.broadcast %170 : vector<1x32xf32> to vector<8x32xf32>
    %172 = arith.mulf %169, %171 : vector<8x32xf32>
    %cst_35 = arith.constant dense<0.000000e+00> : vector<8xf32>
    %173 = vector.multi_reduction <add>, %172, %cst_35 [1] : vector<8x32xf32> to vector<8xf32>
    %174 = vector.shape_cast %173 : vector<8xf32> to vector<8x1xf32>
    %c0_36 = arith.constant 0 : index
    %c0_37 = arith.constant 0 : index
    %175 = vector.load %arg5[%c0_36, %c0_37] : memref<1x1xf32, #tpu.memory_space<vmem>>, vector<1x1xf32>
    %176 = vector.broadcast %175 : vector<1x1xf32> to vector<8x1xf32>
    %177 = arith.addf %174, %176 : vector<8x1xf32>
    %c0_38 = arith.constant 0 : index
    %c0_39 = arith.constant 0 : index
    %178 = vector.load %arg6[%c0_38, %c0_39] : memref<8x1xf32, #tpu.memory_space<vmem>>, vector<8x1xf32>
    tpu.vector_store %arg6[%c0_38, %c0_39], %177 {strides = array<i32>} : memref<8x1xf32, #tpu.memory_space<vmem>>, vector<8x1xf32>,
    return
  }
}

</mosaic_0001>

<bundles_post_ra>
// kernel: tpu_custom_call.1
= control target key start
LH: loop header
LB: loop body
LE: loop exit
PB: predicated region body
PF: predicated region fallthrough
CT: control target
= control target key end

     0   :  { %vm67_vm0 = vcmask 1043456   ;;  %vm42_vm1 = vcmask 31744   ;;  %v978_v0 = vmov 0.0   ;;  %vm979_vm2 = vmmov 0   ;;  %s981_s11 = smov 64   ;;  %s983_s25 = smov 96   ;;  %s1192_s2 = inlined_call_operand.vmem [shape: f32[32,128], index: 2, kind: input, shape index: {}]   ;;  %s1193_s1 = inlined_call_operand.vmem [shape: f32[4,128], index: 1, kind: input, shape index: {}]   ;;  %s1194_s0 = inlined_call_operand.vmem [shape: f32[64,4], index: 0, kind: input, shape index: {}]   ;;  %s1195_s3 = inlined_call_operand.vmem [shape: f32[1,128], index: 3, kind: input, shape index: {}]   ;;  %s1196_s4 = inlined_call_operand.vmem [shape: f32[1,32], index: 4, kind: input, shape index: {}]   ;;  %s1197_s5 = inlined_call_operand.<no memory space> [shape: f32[1,1], index: 5, kind: input, shape index: {}]   ;;  %s1198_s6 = inlined_call_operand.vmem [shape: f32[8,1], index: 6, kind: output, shape index: {}]  }
   0x1   :  { %844 = vmatprep.subr.bf16.mxu1 %v978_v0  ;;  %v176_v1 = vld [vmem:[%s1192_s2] sm:$0xff]  ;;  %v177_v2 = vld [vmem:[%s1192_s2 + $0x8] sm:$0xff]  ;;  %848 = vmatprep.mubr.msk.bf16.mxu1 %vm979_vm2, %v978_v0  ;;  %v178_v7 = vld [vmem:[%s1192_s2 + $0x10] sm:$0xff]  ;;  %v980_v10 = vmov 0   ;;  %vm182_vm3 = vcmask 261120   ;;  %vm772_vm4 = vcmask 7168  }
   0x2   :  { %v34_v3 = vld [vmem:[%s1193_s1] sm:$0xf]  ;;  %v1031_v4 = vpack.c.bf16 %v177_v2, %v176_v1  ;;  %v27_v6 = vld [vmem:[%s1194_s0 + $0x8] sm:$0xff]  ;;  %v179_v8 = vld [vmem:[%s1192_s2 + $0x18] sm:$0xff] }
   0x3   :  { %830 = vmatprep.subr.msk.mxu0 %vm67_vm0, %v34_v3  ;;  %v26_v5 = vld [vmem:[%s1194_s0] sm:$0xff]  ;;  %v1048_v9 = vpack.c.bf16 %v179_v8, %v178_v7  ;;  %v28_v53 = vld [vmem:[%s1194_s0 + $0x10] sm:$0xff]  ;;  %v29_v54 = vld [vmem:[%s1194_s0 + $0x18] sm:$0xff] }
   0x4   :  { %831 = vmatpush3.msk.msra.mxu0 %vm67_vm0, %v34_v3  ;;  %832 = vmatprep.mubr.msk.f32.mxu0 %vm42_vm1, %v26_v5  ;;  %v1067_v12 = vld [vmem:[%s1195_s3] ss:$0 sm:$0xff]  ;;  %s982_s3 = smov 32   ;;  %v31_v56 = vld [vmem:[%s1194_s0 + $0x28] sm:$0xff]  ;;  %v32_v57 = vld [vmem:[%s1194_s0 + $0x30] sm:$0xff] }
   0x5   :  { %845 = vmatpush3.bf16.msra.mxu1 %v1031_v4  ;;  %833 = vmatmul.mubr.msk.f32.vlgmr.msra.gmra.mrb[0].mxu0 %vm42_vm1, %v27_v6  ;;  %v30_v55 = vld [vmem:[%s1194_s0 + $0x20] sm:$0xff]  ;;  %v33_v58 = vld [vmem:[%s1194_s0 + $0x38] sm:$0xff] }
   0x6   :  { %846 = vmatprep.subr.bf16.mxu1 %v978_v0  ;;  %860 = vmatprep.subr.bf16.mxu0 %v978_v0 }
   0x7   :  { %861 = vmatpush3.bf16.msra.mxu0 %v1031_v4  ;;  %835 = vmatprep.mubr.msk.f32.mxu0 %vm42_vm1, %v28_v53 }
   0x8   :  { %862 = vmatprep.subr.bf16.mxu0 %v978_v0 }
   0x9   :  { %847 = vmatpush3.bf16.msra.mxu1 %v1048_v9  ;;  %836 = vmatmul.mubr.msk.f32.gmra.mrb[2].mxu0 %vm42_vm1, %v29_v54 }
   0xa   :  { %852 = vmatprep.subr.bf16.mxu1 %v978_v0  ;;  %838 = vmatprep.mubr.msk.f32.mxu0 %vm42_vm1, %v30_v55 }
   0xb   :  { %863 = vmatpush3.bf16.msra.mxu0 %v1048_v9 }
   0xc   :  { %849 = vmatmul.mubr.bf16.vlgmr.msra.gmra.mrb[0].mxu1 %v980_v10  ;;  %876 = vmatprep.subr.bf16.mxu0 %v978_v0 }
   0xd   :  { %853 = vmatpush3.bf16.msra.mxu1 %v1031_v4  ;;  %856 = vmatprep.mubr.msk.bf16.mxu1 %vm979_vm2, %v978_v0 }
   0xe   :  { %854 = vmatprep.subr.bf16.mxu1 %v978_v0  ;;  %839 = vmatmul.mubr.msk.f32.gmra.mrb[4].mxu0 %vm42_vm1, %v31_v56 }
   0xf   :  { %841 = vmatprep.mubr.msk.f32.mxu0 %vm42_vm1, %v32_v57 }
  0x11   :  { %855 = vmatpush3.bf16.msra.mxu1 %v1048_v9 }
  0x12   :  { %868 = vmatprep.subr.bf16.mxu1 %v978_v0  ;;  %842 = vmatmul.mubr.msk.f32.gmra.mrb[6].mxu0 %vm42_vm1, %v33_v58 }
  0x13   :  { %864 = vmatprep.mubr.msk.bf16.mxu0 %vm979_vm2, %v978_v0 }
  0xd8   :  { %v834_v11 = vpop.f32.mrb[0].mxu0 }
  0xd9   :  { %v137_v13 = vpop.f32.mrb[1].mxu0  ;;  %v143_v36 = vadd.f32 %v834_v11, %v1067_v12 }
  0xda   :  { %v138_v14 = vadd.f32 %v1067_v12, %v137_v13 }
  0xdc   :  { %v837_v63 = vpop.f32.mrb[2].mxu0 }
  0xdd   :  { %v147_v1 = vpop.f32.mrb[3].mxu0 }
  0xde   :  { %v148_v8 = vadd.f32 %v1067_v12, %v147_v1 }
  0xdf   :  { %v220_v15 = vpop.f32.mrb[0].mxu1 }
  0xe0   :  { %v226_v16 = vadd.f32 %v220_v15, %v138_v14  ;;  %v850_v17 = vpop.f32.mrb[1].mxu1 }
  0xe1   :  { %v223_v18 = vpop.f32.mrb[2].mxu1  ;;  %v1112_v2 = vpop.f32.mrb[4].mxu0 }
  0xe2   :  { %914 = vtanh.f32 %v226_v16  ;;  %v851_v19 = vpop.f32.mrb[3].mxu1  ;;  %v227_v21 = vsub.f32 0.0, %v226_v16  ;;  %v1114_v3 = vpop.f32.mrb[5].mxu0 }
  0xe3   :  { %v158_v54 = vadd.f32 %v1067_v12, %v1114_v3 }
  0xe4   :  { %v228_v22 = vmul.f32 1.442695, %v227_v21 }
  0xe5   :  { %v1116_v5 = vpop.f32.mrb[6].mxu0 }
  0xe6   :  { %916 = vpow2.f32 %v228_v22  ;;  %v1118_v6 = vpop.f32.mrb[7].mxu0 }
  0xec   :  { %v915_v20 = vpop.eup %914 }
  0xed   :  { %235 = vrot.lane.b32.xlu0 %v915_v20, %s981_s11 }
  0xf0   :  { %v917_v23 = vpop.eup %916 }
  0xf1   :  { %v230_v24 = vadd.f32 1.0, %v917_v23 }
  0xf3   :  { %918 = vrcp.f32 %v230_v24 }
  0xfd   :  { %v919_v25 = vpop.eup %918 }
  0xfe   :  { %v233_v28 = vmul.f32 0.0, %v919_v25 }
 0x15f   :  { %v236_v26 = vpop.permute.xlu0 %235 }
 0x160   :  { %v238_v27 = vmul.f32 %v919_v25, %v236_v26 }
 0x162   :  { %240 = vrot.lane.b32.xlu0 %v238_v27, %s982_s3 }
 0x1d4   :  { %v241_v29 = vpop.permute.xlu0 %240 }
 0x1d5   :  { %v243_v30 = vadd.f32 %v241_v29, %v233_v28 }
 0x1d7   :  { %920 = vtanh.f32 %v243_v30 }
 0x1e1   :  { %v921_v31 = vpop.eup %920 }
 0x1e2   :  { %246 = vrot.lane.b32.xlu1 %v921_v31, %s981_s11 }
 0x254   :  { %v247_v32 = vpop.permute.xlu1 %246 }
 0x255   :  { %v249_v33 = vmul.f32 %v919_v25, %v247_v32  ;;  %v153_v32 = vadd.f32 %v837_v63, %v1067_v12 }
 0x257   :  { %v250_v34 = vpack.c.bf16 %v249_v33, %v249_v33 }
 0x259   :  { %252 = vrot.lane.b32.xlu1 %v250_v34, %s982_s3 }
 0x2cb   :  { %v253_v35 = vpop.permute.xlu1 %252 }
 0x2cc   :  { %857 = vmatmul.mubr.msk.bf16.vlgmr.msra.gmra.mrb[4].mxu1 %vm182_vm3, %v253_v35 }
 0x2cd   :  { %869 = vmatpush3.bf16.msra.mxu1 %v1031_v4  ;;  %872 = vmatprep.mubr.msk.bf16.mxu1 %vm979_vm2, %v978_v0 }
 0x2ce   :  { %870 = vmatprep.subr.bf16.mxu1 %v978_v0 }
 0x2d1   :  { %871 = vmatpush3.bf16.msra.mxu1 %v1048_v9 }
 0x2d2   :  { %884 = vmatprep.subr.bf16.mxu1 %v978_v0 }
 0x39f   :  { %v291_v37 = vpop.f32.mrb[4].mxu1 }
 0x3a0   :  { %v297_v38 = vadd.f32 %v291_v37, %v143_v36  ;;  %v858_v39 = vpop.f32.mrb[5].mxu1 }
 0x3a1   :  { %v294_v40 = vpop.f32.mrb[6].mxu1 }
 0x3a2   :  { %922 = vtanh.f32 %v297_v38  ;;  %v859_v41 = vpop.f32.mrb[7].mxu1  ;;  %v298_v43 = vsub.f32 0.0, %v297_v38 }
 0x3a4   :  { %v299_v44 = vmul.f32 1.442695, %v298_v43 }
 0x3a6   :  { %924 = vpow2.f32 %v299_v44 }
 0x3ac   :  { %v923_v42 = vpop.eup %922 }
 0x3ad   :  { %306 = vrot.lane.b32.xlu0 %v923_v42, %s981_s11 }
 0x3b0   :  { %v925_v45 = vpop.eup %924 }
 0x3b1   :  { %v301_v46 = vadd.f32 1.0, %v925_v45 }
 0x3b3   :  { %926 = vrcp.f32 %v301_v46 }
 0x3bd   :  { %v927_v47 = vpop.eup %926 }
 0x3be   :  { %v304_v50 = vmul.f32 %v927_v47, %v243_v30 }
 0x41f   :  { %v307_v48 = vpop.permute.xlu0 %306 }
 0x420   :  { %v309_v49 = vmul.f32 %v927_v47, %v307_v48 }
 0x422   :  { %311 = vrot.lane.b32.xlu1 %v309_v49, %s982_s3 }
 0x494   :  { %v312_v51 = vpop.permute.xlu1 %311 }
 0x495   :  { %v314_v52 = vadd.f32 %v312_v51, %v304_v50 }
 0x497   :  { %928 = vtanh.f32 %v314_v52 }
 0x4a1   :  { %v929_v59 = vpop.eup %928 }
 0x4a2   :  { %317 = vrot.lane.b32.xlu0 %v929_v59, %s981_s11 }
 0x514   :  { %v318_v60 = vpop.permute.xlu0 %317 }
 0x515   :  { %v320_v61 = vmul.f32 %v927_v47, %v318_v60 }
 0x517   :  { %v321_v62 = vpack.c.bf16 %v320_v61, %v320_v61 }
 0x519   :  { %323 = vrot.lane.b32.xlu1 %v321_v62, %s982_s3 }
 0x58b   :  { %v324_v7 = vpop.permute.xlu1 %323 }
 0x58c   :  { %865 = vmatmul.mubr.msk.bf16.vlgmr.msra.gmra.mrb[8].mxu0 %vm182_vm3, %v324_v7 }
 0x58d   :  { %877 = vmatpush3.bf16.msra.mxu0 %v1031_v4  ;;  %880 = vmatprep.mubr.msk.bf16.mxu0 %vm979_vm2, %v978_v0 }
 0x58e   :  { %878 = vmatprep.subr.bf16.mxu0 %v978_v0 }
 0x591   :  { %879 = vmatpush3.bf16.msra.mxu0 %v1048_v9 }
 0x592   :  { %892 = vmatprep.subr.bf16.mxu0 %v978_v0 }
 0x65f   :  { %v362_v10 = vpop.f32.mrb[8].mxu0 }
 0x660   :  { %v368_v11 = vadd.f32 %v362_v10, %v148_v8  ;;  %v866_v13 = vpop.f32.mrb[9].mxu0 }
 0x661   :  { %v365_v14 = vpop.f32.mrb[10].mxu0 }
 0x662   :  { %930 = vtanh.f32 %v368_v11  ;;  %v867_v15 = vpop.f32.mrb[11].mxu0  ;;  %v369_v17 = vsub.f32 0.0, %v368_v11 }
 0x664   :  { %v370_v18 = vmul.f32 1.442695, %v369_v17 }
 0x666   :  { %932 = vpow2.f32 %v370_v18 }
 0x66c   :  { %v931_v16 = vpop.eup %930 }
 0x66d   :  { %377 = vrot.lane.b32.xlu0 %v931_v16, %s981_s11 }
 0x670   :  { %v933_v19 = vpop.eup %932 }
 0x671   :  { %v372_v20 = vadd.f32 1.0, %v933_v19  ;;  %v163_v19 = vadd.f32 %v1112_v2, %v1067_v12 }
 0x673   :  { %934 = vrcp.f32 %v372_v20 }
 0x67d   :  { %v935_v21 = vpop.eup %934 }
 0x67e   :  { %v375_v24 = vmul.f32 %v935_v21, %v314_v52 }
 0x6df   :  { %v378_v22 = vpop.permute.xlu0 %377 }
 0x6e0   :  { %v380_v23 = vmul.f32 %v935_v21, %v378_v22 }
 0x6e2   :  { %382 = vrot.lane.b32.xlu1 %v380_v23, %s982_s3 }
 0x754   :  { %v383_v25 = vpop.permute.xlu1 %382 }
 0x755   :  { %v385_v26 = vadd.f32 %v383_v25, %v375_v24 }
 0x757   :  { %936 = vtanh.f32 %v385_v26 }
 0x761   :  { %v937_v27 = vpop.eup %936 }
 0x762   :  { %388 = vrot.lane.b32.xlu0 %v937_v27, %s981_s11 }
 0x7d4   :  { %v389_v28 = vpop.permute.xlu0 %388 }
 0x7d5   :  { %v391_v29 = vmul.f32 %v935_v21, %v389_v28 }
 0x7d7   :  { %v392_v30 = vpack.c.bf16 %v391_v29, %v391_v29 }
 0x7d9   :  { %394 = vrot.lane.b32.xlu1 %v392_v30, %s982_s3 }
 0x84b   :  { %v395_v31 = vpop.permute.xlu1 %394 }
 0x84c   :  { %873 = vmatmul.mubr.msk.bf16.vlgmr.msra.gmra.mrb[8].mxu1 %vm182_vm3, %v395_v31 }
 0x84d   :  { %885 = vmatpush3.bf16.msra.mxu1 %v1031_v4  ;;  %888 = vmatprep.mubr.msk.bf16.mxu1 %vm979_vm2, %v978_v0 }
 0x84e   :  { %886 = vmatprep.subr.bf16.mxu1 %v978_v0 }
 0x851   :  { %887 = vmatpush3.bf16.msra.mxu1 %v1048_v9 }
 0x852   :  { %900 = vmatprep.subr.bf16.mxu1 %v978_v0 }
 0x91f   :  { %v433_v33 = vpop.f32.mrb[8].mxu1 }
 0x920   :  { %v439_v34 = vadd.f32 %v433_v33, %v153_v32  ;;  %v874_v35 = vpop.f32.mrb[9].mxu1 }
 0x921   :  { %v436_v36 = vpop.f32.mrb[10].mxu1 }
 0x922   :  { %938 = vtanh.f32 %v439_v34  ;;  %v875_v37 = vpop.f32.mrb[11].mxu1  ;;  %v440_v39 = vsub.f32 0.0, %v439_v34 }
 0x923   :  { %v168_v37 = vadd.f32 %v1067_v12, %v1118_v6 }
 0x924   :  { %v441_v40 = vmul.f32 1.442695, %v440_v39 }
 0x926   :  { %940 = vpow2.f32 %v441_v40 }
 0x92c   :  { %v939_v38 = vpop.eup %938 }
 0x92d   :  { %448 = vrot.lane.b32.xlu0 %v939_v38, %s981_s11 }
 0x930   :  { %v941_v41 = vpop.eup %940 }
 0x931   :  { %v443_v42 = vadd.f32 1.0, %v941_v41 }
 0x933   :  { %942 = vrcp.f32 %v443_v42 }
 0x93d   :  { %v943_v43 = vpop.eup %942 }
 0x93e   :  { %v446_v46 = vmul.f32 %v943_v43, %v385_v26 }
 0x99f   :  { %v449_v44 = vpop.permute.xlu0 %448 }
 0x9a0   :  { %v451_v45 = vmul.f32 %v943_v43, %v449_v44 }
 0x9a2   :  { %453 = vrot.lane.b32.xlu1 %v451_v45, %s982_s3 }
 0xa14   :  { %v454_v47 = vpop.permute.xlu1 %453 }
 0xa15   :  { %v456_v48 = vadd.f32 %v454_v47, %v446_v46 }
 0xa17   :  { %944 = vtanh.f32 %v456_v48 }
 0xa21   :  { %v945_v49 = vpop.eup %944 }
 0xa22   :  { %459 = vrot.lane.b32.xlu0 %v945_v49, %s981_s11 }
 0xa94   :  { %v460_v50 = vpop.permute.xlu0 %459 }
 0xa95   :  { %v462_v51 = vmul.f32 %v943_v43, %v460_v50 }
 0xa97   :  { %v463_v52 = vpack.c.bf16 %v462_v51, %v462_v51 }
 0xa99   :  { %465 = vrot.lane.b32.xlu1 %v463_v52, %s982_s3 }
 0xb0b   :  { %v466_v53 = vpop.permute.xlu1 %465 }
 0xb0c   :  { %881 = vmatmul.mubr.msk.bf16.vlgmr.msra.gmra.mrb[12].mxu0 %vm182_vm3, %v466_v53 }
 0xb0d   :  { %893 = vmatpush3.bf16.msra.mxu0 %v1031_v4  ;;  %896 = vmatprep.mubr.msk.bf16.mxu0 %vm979_vm2, %v978_v0 }
 0xb0e   :  { %894 = vmatprep.subr.bf16.mxu0 %v978_v0 }
 0xb11   :  { %895 = vmatpush3.bf16.msra.mxu0 %v1048_v9 }
 0xbdf   :  { %v504_v55 = vpop.f32.mrb[12].mxu0 }
 0xbe0   :  { %v510_v56 = vadd.f32 %v504_v55, %v158_v54  ;;  %v882_v57 = vpop.f32.mrb[13].mxu0 }
 0xbe1   :  { %v507_v58 = vpop.f32.mrb[14].mxu0 }
 0xbe2   :  { %946 = vtanh.f32 %v510_v56  ;;  %v883_v59 = vpop.f32.mrb[15].mxu0  ;;  %v511_v61 = vsub.f32 0.0, %v510_v56  ;;  %v173_v58 = vadd.f32 %v1116_v5, %v1067_v12  ;;  %v795_v12 = vld [vmem:[%s1196_s4] ss:$0 sm:$0xff] }
 0xbe4   :  { %v512_v62 = vmul.f32 1.442695, %v511_v61 }
 0xbe6   :  { %948 = vpow2.f32 %v512_v62 }
 0xbec   :  { %v947_v60 = vpop.eup %946 }
 0xbed   :  { %519 = vrot.lane.b32.xlu0 %v947_v60, %s981_s11 }
 0xbf0   :  { %v949_v63 = vpop.eup %948 }
 0xbf1   :  { %v514_v1 = vadd.f32 1.0, %v949_v63 }
 0xbf3   :  { %950 = vrcp.f32 %v514_v1 }
 0xbfd   :  { %v951_v7 = vpop.eup %950 }
 0xbfe   :  { %v517_v3 = vmul.f32 %v951_v7, %v456_v48 }
 0xc5f   :  { %v520_v8 = vpop.permute.xlu0 %519 }
 0xc60   :  { %v522_v10 = vmul.f32 %v951_v7, %v520_v8 }
 0xc62   :  { %524 = vrot.lane.b32.xlu1 %v522_v10, %s982_s3 }
 0xcd4   :  { %v525_v11 = vpop.permute.xlu1 %524 }
 0xcd5   :  { %v527_v13 = vadd.f32 %v525_v11, %v517_v3 }
 0xcd7   :  { %952 = vtanh.f32 %v527_v13 }
 0xce1   :  { %v953_v14 = vpop.eup %952 }
 0xce2   :  { %530 = vrot.lane.b32.xlu0 %v953_v14, %s981_s11 }
 0xd54   :  { %v531_v15 = vpop.permute.xlu0 %530 }
 0xd55   :  { %v533_v16 = vmul.f32 %v951_v7, %v531_v15 }
 0xd57   :  { %v534_v17 = vpack.c.bf16 %v533_v16, %v533_v16 }
 0xd59   :  { %536 = vrot.lane.b32.xlu1 %v534_v17, %s982_s3 }
 0xdcb   :  { %v537_v18 = vpop.permute.xlu1 %536 }
 0xdcc   :  { %889 = vmatmul.mubr.msk.bf16.vlgmr.msra.gmra.mrb[12].mxu1 %vm182_vm3, %v537_v18  ;;  %v11_v18 = vstv %s1197_s5 }
 0xdcd   :  { %901 = vmatpush3.bf16.msra.mxu1 %v1031_v4  ;;  %904 = vmatprep.mubr.msk.bf16.mxu1 %vm979_vm2, %v978_v0  ;;  %12 = vst [vmem:[#allocation2] sm:$0x1] %v11_v18 }
 0xdce   :  { %902 = vmatprep.subr.bf16.mxu1 %v978_v0 }
 0xdd1   :  { %903 = vmatpush3.bf16.msra.mxu1 %v1048_v9 }
 0xe9f   :  { %v575_v20 = vpop.f32.mrb[12].mxu1 }
 0xea0   :  { %v581_v21 = vadd.f32 %v575_v20, %v163_v19  ;;  %v890_v22 = vpop.f32.mrb[13].mxu1 }
 0xea1   :  { %v578_v23 = vpop.f32.mrb[14].mxu1 }
 0xea2   :  { %954 = vtanh.f32 %v581_v21  ;;  %v891_v24 = vpop.f32.mrb[15].mxu1  ;;  %v582_v4 = vsub.f32 0.0, %v581_v21 }
 0xea4   :  { %v583_v26 = vmul.f32 1.442695, %v582_v4 }
 0xea6   :  { %956 = vpow2.f32 %v583_v26 }
 0xeac   :  { %v955_v25 = vpop.eup %954 }
 0xead   :  { %590 = vrot.lane.b32.xlu0 %v955_v25, %s981_s11  ;;  %v796_v25 = vld [vmem:[#allocation2] ss:$0 sm:$0xff] }
 0xeb0   :  { %v957_v27 = vpop.eup %956 }
 0xeb1   :  { %v585_v28 = vadd.f32 1.0, %v957_v27 }
 0xeb3   :  { %958 = vrcp.f32 %v585_v28 }
 0xebd   :  { %v959_v0 = vpop.eup %958 }
 0xebe   :  { %v588_v2 = vmul.f32 %v959_v0, %v527_v13 }
 0xf1f   :  { %v591_v9 = vpop.permute.xlu0 %590 }
 0xf20   :  { %v593_v29 = vmul.f32 %v959_v0, %v591_v9 }
 0xf22   :  { %595 = vrot.lane.b32.xlu1 %v593_v29, %s982_s3 }
 0xf94   :  { %v596_v30 = vpop.permute.xlu1 %595 }
 0xf95   :  { %v598_v31 = vadd.f32 %v596_v30, %v588_v2 }
 0xf97   :  { %960 = vtanh.f32 %v598_v31 }
 0xfa1   :  { %v961_v32 = vpop.eup %960 }
 0xfa2   :  { %601 = vrot.lane.b32.xlu0 %v961_v32, %s981_s11 }
0x1014   :  { %v602_v33 = vpop.permute.xlu0 %601 }
0x1015   :  { %v604_v34 = vmul.f32 %v959_v0, %v602_v33 }
0x1017   :  { %v605_v35 = vpack.c.bf16 %v604_v34, %v604_v34 }
0x1019   :  { %607 = vrot.lane.b32.xlu1 %v605_v35, %s982_s3 }
0x108b   :  { %v608_v36 = vpop.permute.xlu1 %607 }
0x108c   :  { %897 = vmatmul.mubr.msk.bf16.vlgmr.msra.gmra.mrb[16].mxu0 %vm182_vm3, %v608_v36 }
0x115f   :  { %v646_v38 = vpop.f32.mrb[16].mxu0 }
0x1160   :  { %v652_v39 = vadd.f32 %v646_v38, %v168_v37  ;;  %v898_v40 = vpop.f32.mrb[17].mxu0 }
0x1161   :  { %v649_v41 = vpop.f32.mrb[18].mxu0 }
0x1162   :  { %962 = vtanh.f32 %v652_v39  ;;  %v899_v42 = vpop.f32.mrb[19].mxu0  ;;  %v653_v44 = vsub.f32 0.0, %v652_v39 }
0x1164   :  { %v654_v45 = vmul.f32 1.442695, %v653_v44 }
0x1166   :  { %964 = vpow2.f32 %v654_v45 }
0x116c   :  { %v963_v43 = vpop.eup %962 }
0x116d   :  { %661 = vrot.lane.b32.xlu0 %v963_v43, %s981_s11 }
0x1170   :  { %v965_v46 = vpop.eup %964 }
0x1171   :  { %v656_v47 = vadd.f32 1.0, %v965_v46 }
0x1173   :  { %966 = vrcp.f32 %v656_v47 }
0x117d   :  { %v967_v48 = vpop.eup %966 }
0x117e   :  { %v659_v6 = vmul.f32 %v967_v48, %v598_v31 }
0x11df   :  { %v662_v49 = vpop.permute.xlu0 %661 }
0x11e0   :  { %v664_v50 = vmul.f32 %v967_v48, %v662_v49 }
0x11e2   :  { %666 = vrot.lane.b32.xlu1 %v664_v50, %s982_s3 }
0x1254   :  { %v667_v51 = vpop.permute.xlu1 %666 }
0x1255   :  { %v669_v52 = vadd.f32 %v667_v51, %v659_v6 }
0x1257   :  { %968 = vtanh.f32 %v669_v52 }
0x1261   :  { %v969_v53 = vpop.eup %968 }
0x1262   :  { %672 = vrot.lane.b32.xlu0 %v969_v53, %s981_s11 }
0x12d4   :  { %v673_v54 = vpop.permute.xlu0 %672 }
0x12d5   :  { %v675_v55 = vmul.f32 %v967_v48, %v673_v54 }
0x12d7   :  { %v676_v56 = vpack.c.bf16 %v675_v55, %v675_v55 }
0x12d9   :  { %678 = vrot.lane.b32.xlu1 %v676_v56, %s982_s3 }
0x134b   :  { %v679_v57 = vpop.permute.xlu1 %678 }
0x134c   :  { %905 = vmatmul.mubr.msk.bf16.vlgmr.msra.gmra.mrb[16].mxu1 %vm182_vm3, %v679_v57 }
0x141f   :  { %v717_v59 = vpop.f32.mrb[16].mxu1 }
0x1420   :  { %v723_v60 = vadd.f32 %v717_v59, %v173_v58  ;;  %v906_v61 = vpop.f32.mrb[17].mxu1 }
0x1421   :  { %v720_v62 = vpop.f32.mrb[18].mxu1 }
0x1422   :  { %970 = vtanh.f32 %v723_v60  ;;  %v907_v63 = vpop.f32.mrb[19].mxu1  ;;  %v724_v7 = vsub.f32 0.0, %v723_v60 }
0x1424   :  { %v725_v8 = vmul.f32 1.442695, %v724_v7 }
0x1426   :  { %972 = vpow2.f32 %v725_v8 }
0x142c   :  { %v971_v1 = vpop.eup %970 }
0x142d   :  { %732 = vrot.lane.b32.xlu0 %v971_v1, %s981_s11 }
0x1430   :  { %v973_v10 = vpop.eup %972 }
0x1431   :  { %v727_v3 = vadd.f32 1.0, %v973_v10 }
0x1433   :  { %974 = vrcp.f32 %v727_v3 }
0x143d   :  { %v975_v11 = vpop.eup %974 }
0x143e   :  { %v730_v5 = vmul.f32 %v975_v11, %v669_v52 }
0x149f   :  { %v733_v13 = vpop.permute.xlu0 %732 }
0x14a0   :  { %v735_v14 = vmul.f32 %v975_v11, %v733_v13 }
0x14a2   :  { %737 = vrot.lane.b32.xlu1 %v735_v14, %s982_s3 }
0x14a6   :  { %753 = vrot.lane.b32.xlu1 %v795_v12, %s983_s25 }
0x1514   :  { %v738_v15 = vpop.permute.xlu1 %737 }
0x1515   :  { %v740_v16 = vadd.f32 %v738_v15, %v730_v5 }
0x1517   :  { %976 = vtanh.f32 %v740_v16 }
0x1518   :  { %v754_v20 = vpop.permute.xlu1 %753 }
0x1521   :  { %v977_v17 = vpop.eup %976 }
0x1522   :  { %743 = vrot.lane.b32.xlu0 %v977_v17, %s981_s11 }
0x1594   :  { %v744_v19 = vpop.permute.xlu0 %743 }
0x1595   :  { %v746_v21 = vmul.f32 %v975_v11, %v744_v19 }
0x1597   :  { %v756_v22 = vmul.f32 %v754_v20, %v746_v21 }
0x1599   :  { %758 = vrot.lane.b32.xlu0 %v756_v22, %s982_s3 }
0x160b   :  { %v759_v23 = vpop.permute.xlu0 %758 }
0x160c   :  { %v761_v24 = vsel %vm182_vm3, %v759_v23, 0.0 }
0x160d   :  { %762 = vadd.xlane.f32.xlu1 %v761_v24 }
0x169a   :  { %v763_v4 = vpop.xlane.xlu1 %762 }
0x169b   :  { %v771_v26 = vadd.f32 %v796_v25, %v763_v4 }
0x169d   :  { %773 = vst.msk [vmem:[%s1198_s6] sm:$0xff] %vm772_vm4, %v771_v26 }

</bundles_post_ra>
